<compile_context>
chip_gen: v6e
topology: v6e:2x2x1
jax: 0.10.0
libtpu: 0.0.40
codegen_flags: <defaults>
</compile_context>

<pallas_src>
import functools

import jax
import jax.numpy as jnp
from jax.experimental import pallas as pl
from jax.experimental.pallas import tpu as pltpu

LANE = 128
_TARGET_BLOCK_BYTES = 4 << 20   # ~4 MiB per array per pipeline buffer
_VMEM_SLACK_BYTES = 4 << 20


# --------------------------------------------------------------------------
# Kernels
# --------------------------------------------------------------------------
def _mse_sum_kernel(p_ref, t_ref, o_ref, acc_ref, *, scale, bps, valid_blocks):
    """Accumulate sum((pred-target)^2); write scaled (8,128) partials at end."""
    i = pl.program_id(1)

    @pl.when(i == 0)
    def _init():
        acc_ref[...] = jnp.zeros_like(acc_ref)

    g = pl.program_id(0) * bps + i

    @pl.when(g < valid_blocks)  # skip the (at most one) clamped out-of-range step
    def _acc():
        d = p_ref[...].astype(jnp.float32) - t_ref[...].astype(jnp.float32)
        acc_ref[...] += jnp.sum((d * d).reshape(-1, 8, LANE), axis=0)

    @pl.when(i == pl.num_programs(1) - 1)
    def _fin():
        o_ref[...] = acc_ref[...] * jnp.float32(scale)


def _mse_weighted_sum_kernel(p_ref, t_ref, w_ref, o_ref, acc_ref, *,
                             scale, bps, valid_blocks):
    """Accumulate sum(w * (pred-target)^2).  (Denominator handled in wrapper.)"""
    i = pl.program_id(1)

    @pl.when(i == 0)
    def _init():
        acc_ref[...] = jnp.zeros_like(acc_ref)

    g = pl.program_id(0) * bps + i

    @pl.when(g < valid_blocks)
    def _acc():
        p = p_ref[...].astype(jnp.float32)
        t = t_ref[...].astype(jnp.float32)
        w = w_ref[...].astype(jnp.float32)
        d = p - t
        acc_ref[...] += jnp.sum((w * d * d).reshape(-1, 8, LANE), axis=0)

    @pl.when(i == pl.num_programs(1) - 1)
    def _fin():
        o_ref[...] = acc_ref[...] * jnp.float32(scale)


def _mse_none_kernel(p_ref, t_ref, o_ref, *, loss_weight):
    d = p_ref[...].astype(jnp.float32) - t_ref[...].astype(jnp.float32)
    o_ref[...] = (jnp.float32(loss_weight) * d * d).astype(o_ref.dtype)


def _mse_none_weighted_kernel(p_ref, t_ref, w_ref, o_ref, *, loss_weight):
    d = p_ref[...].astype(jnp.float32) - t_ref[...].astype(jnp.float32)
    v = jnp.float32(loss_weight) * d * d * w_ref[...].astype(jnp.float32)
    o_ref[...] = v.astype(o_ref.dtype)


# --------------------------------------------------------------------------
# Wrapper helpers
# --------------------------------------------------------------------------
def _physical_vmem_bytes():
    try:
        return int(pltpu.get_tpu_info().vmem_capacity_bytes)
    except Exception:
        return 64 << 20   # conservative (v7x per-TensorCore VMEM)


def _row_align(*dtypes):
    """Sublane alignment of the slab (8 for 32-bit, 16 for bf16, 32 for 8-bit)."""
    a = 8
    for dt in dtypes:
        itemsize = jnp.dtype(dt).itemsize
        a = max(a, 8 * max(1, 4 // itemsize))
    return a


def _budget_rows(dtypes, n_arrays, row_align):
    """Rows per block so the largest array's block is ~4 MiB (VMEM-budgeted)."""
    phys = _physical_vmem_bytes()
    max_item = max(jnp.dtype(dt).itemsize for dt in dtypes)
    # Keep 2 * n_arrays double-buffered blocks within ~half of physical VMEM.
    per_array_cap = max(1 << 20, (phys // 2) // max(1, 2 * n_arrays))
    block_bytes = min(_TARGET_BLOCK_BYTES, per_array_cap)
    rows = max(row_align, block_bytes // (LANE * max_item))
    return max(row_align, (rows // row_align) * row_align)


def _vmem_limit(block_rows, dtypes):
    blk_bytes = sum(block_rows * LANE * jnp.dtype(dt).itemsize for dt in dtypes)
    limit = 2 * blk_bytes + _VMEM_SLACK_BYTES
    limit = max(limit, 16 << 20)
    limit = min(limit, _physical_vmem_bytes() - (8 << 20))
    return int(limit)


def _slab(x, rows):
    """Flatten to a lane-dense (rows, 128) slab; zero-pad only a ragged tail.

    When x.size == rows*128 this is a pure (layout-preserving) reshape: no copy.
    """
    flat = jnp.reshape(x, (-1,))
    padded = rows * LANE
    if padded != flat.shape[0]:
        flat = jnp.pad(flat, (0, padded - flat.shape[0]))
    return flat.reshape(rows, LANE)


# --------------------------------------------------------------------------
# 'none' (elementwise) path
# --------------------------------------------------------------------------
def _mse_none(pred, target, w_full, loss_weight, max_block_rows):
    n = int(pred.size)
    out_dtype = jnp.promote_types(pred.dtype, target.dtype)
    if w_full is not None:
        out_dtype = jnp.promote_types(out_dtype, w_full.dtype)

    dts = [pred.dtype, target.dtype, out_dtype] + (
        [w_full.dtype] if w_full is not None else [])
    row_align = _row_align(*dts)
    budget = _budget_rows(dts, len(dts), row_align)
    if max_block_rows is not None:
        budget = max(row_align, (min(budget, max_block_rows) // row_align) * row_align)

    rows = -(-n // LANE)
    rows = -(-rows // row_align) * row_align
    if rows <= budget:
        block_rows = rows
    else:
        block_rows = budget
        rows = -(-rows // block_rows) * block_rows   # pad to a block multiple
    num_blocks = rows // block_rows

    p2 = _slab(pred, rows)
    t2 = _slab(target, rows)
    in_arrs = [p2, t2]
    if w_full is not None:
        in_arrs.append(_slab(w_full, rows))
        kernel = functools.partial(_mse_none_weighted_kernel, loss_weight=loss_weight)
    else:
        kernel = functools.partial(_mse_none_kernel, loss_weight=loss_weight)

    spec = pl.BlockSpec((block_rows, LANE), lambda i: (i, 0))
    out = pl.pallas_call(
        kernel,
        out_shape=jax.ShapeDtypeStruct((rows, LANE), out_dtype),
        grid_spec=pltpu.PrefetchScalarGridSpec(
            num_scalar_prefetch=0,
            grid=(num_blocks,),
            in_specs=[spec] * len(in_arrs),
            out_specs=pl.BlockSpec((block_rows, LANE), lambda i: (i, 0)),
        ),
        compiler_params=pltpu.CompilerParams(
            dimension_semantics=("parallel",),
            vmem_limit_bytes=_vmem_limit(block_rows, dts)),
    )(*in_arrs)
    return out.reshape(-1)[:n].reshape(pred.shape)


# --------------------------------------------------------------------------
# Public API
# --------------------------------------------------------------------------
def mse_loss(pred, target, weight=None, loss_weight=1.0, reduction="mean",
             max_block_rows=None):
    """Pallas implementation of basicsr MSELoss.forward."""
    if reduction not in ("none", "mean", "sum"):
        raise ValueError(f"Unsupported reduction mode: {reduction}. "
                         f"Supported ones are: ['none', 'mean', 'sum']")

    n = int(pred.size)

    w_full = None
    ratio = 1
    if weight is not None:
        ratio = int(pred.size) // int(weight.size)   # broadcast multiplicity
        w_full = (weight if tuple(weight.shape) == tuple(pred.shape)
                  else jnp.broadcast_to(weight, pred.shape))

    # ---------------- reduction == 'none' ----------------
    if reduction == "none":
        return _mse_none(pred, target, w_full, loss_weight, max_block_rows)

    # ---------------- reduction == 'mean' / 'sum' ----------------
    in_dts = [pred.dtype, target.dtype] + ([w_full.dtype] if w_full is not None else [])
    row_align = _row_align(*in_dts)
    budget = _budget_rows(in_dts, len(in_dts), row_align)
    if max_block_rows is not None:
        budget = max(row_align, (min(budget, max_block_rows) // row_align) * row_align)

    # Slab: only lane/sublane aligned (copy-free when n % (row_align*128) == 0).
    rows = -(-n // LANE)
    rows = -(-rows // row_align) * row_align

    p2 = _slab(pred, rows)
    t2 = _slab(target, rows)
    w2 = _slab(w_full, rows) if w_full is not None else None

    scale = (loss_weight / n) if (reduction == "mean" and weight is None) else loss_weight

    if rows <= budget:
        block_rows, num_blocks, tail_rows = rows, 1, 0
    else:
        block_rows = budget
        num_blocks = rows // block_rows
        tail_rows = rows - num_blocks * block_rows   # handled in the wrapper

    # Shard across 2 TensorCores whenever there are >=2 blocks (even or odd).
    shards = 2 if num_blocks >= 2 else 1
    bps = -(-num_blocks // shards)

    if shards * bps == num_blocks:
        in_idx = lambda s, i, _b=bps: (s * _b + i, 0)
    else:
        # Last step of shard 1 is out of range: clamp its block index (redundant
        # DMA of a valid block) and gate its accumulation off inside the kernel.
        in_idx = lambda s, i, _b=bps, _nb=num_blocks: (jnp.minimum(s * _b + i, _nb - 1), 0)

    in_spec = pl.BlockSpec((block_rows, LANE), in_idx)
    out_spec = pl.BlockSpec((8, LANE), lambda s, i: (s, 0))

    bytes_in = sum(n * jnp.dtype(dt).itemsize for dt in in_dts)
    cost = pl.CostEstimate(flops=3 * n + (n if w_full is not None else 0),
                           transcendentals=0,
                           bytes_accessed=bytes_in + shards * 8 * LANE * 4)
    cparams = pltpu.CompilerParams(
        dimension_semantics=("parallel", "arbitrary"),
        vmem_limit_bytes=_vmem_limit(block_rows, in_dts))

    if w_full is None:
        kernel = functools.partial(_mse_sum_kernel, scale=scale,
                                   bps=bps, valid_blocks=num_blocks)
        args, specs = (p2, t2), [in_spec, in_spec]
    else:
        kernel = functools.partial(_mse_weighted_sum_kernel, scale=scale,
                                   bps=bps, valid_blocks=num_blocks)
        args, specs = (p2, t2, w2), [in_spec, in_spec, in_spec]

    partials = pl.pallas_call(
        kernel,
        out_shape=jax.ShapeDtypeStruct((shards * 8, LANE), jnp.float32),
        grid_spec=pltpu.PrefetchScalarGridSpec(
            num_scalar_prefetch=0,
            grid=(shards, bps),
            in_specs=specs,
            out_specs=out_spec,
            scratch_shapes=[pltpu.VMEM((8, LANE), jnp.float32)]),
        compiler_params=cparams,
        cost_estimate=cost,
    )(*args)
    total = jnp.sum(partials)   # already scaled by loss_weight (and 1/n if needed)

    if tail_rows:
        s0 = num_blocks * block_rows
        d = p2[s0:].astype(jnp.float32) - t2[s0:].astype(jnp.float32)
        tail = d * d
        if w_full is not None:
            tail = tail * w2[s0:].astype(jnp.float32)
        total = total + jnp.float32(scale) * jnp.sum(tail)

    if reduction == "sum" or weight is None:
        return total
    # Weighted mean (basicsr rule): denom = sum(broadcast weight) = sum(w) * ratio.
    denom = jnp.sum(weight.astype(jnp.float32)) * jnp.float32(ratio)
    return total / denom


class MSELoss:
    """Functional analogue of basicsr.losses.MSELoss (forward only)."""

    def __init__(self, loss_weight=1.0, reduction="mean"):
        if reduction not in ("none", "mean", "sum"):
            raise ValueError(f"Unsupported reduction mode: {reduction}. "
                             f"Supported ones are: ['none', 'mean', 'sum']")
        self.loss_weight = loss_weight
        self.reduction = reduction

    def __call__(self, pred, target, weight=None, **kwargs):
        return mse_loss(pred, target, weight=weight,
                        loss_weight=self.loss_weight, reduction=self.reduction)


# --------------------------------------------------------------------------
# Self-test
# --------------------------------------------------------------------------
def _ref_loss(pred, target, weight, loss_weight, reduction):
    """Pure-jnp reference mirroring the PyTorch module."""
    elem = (pred.astype(jnp.float32) - target.astype(jnp.float32)) ** 2
    if weight is not None:
        wb = jnp.broadcast_to(weight, pred.shape).astype(jnp.float32)
        elem = elem * wb
    if reduction == "none":
        return loss_weight * elem
    if reduction == "sum":
        return loss_weight * jnp.sum(elem)
    if weight is None:
        return loss_weight * jnp.mean(elem)
    return loss_weight * jnp.sum(elem) / jnp.sum(
        jnp.broadcast_to(weight, pred.shape).astype(jnp.float32))


if __name__ == "__main__":
    key = jax.random.PRNGKey(0)
    k1, k2, k3, k4 = jax.random.split(key, 4)

    # NCHW inputs, as in the module docstring: [N, C, H, W] = [2, 4, 16, 16]
    shape = (2, 4, 16, 16)
    pred = jax.random.normal(k1, shape, dtype=jnp.float32)
    target = jax.random.normal(k2, shape, dtype=jnp.float32)
    weight = jax.random.uniform(k3, shape, dtype=jnp.float32)
    weight_c1 = jax.random.uniform(k4, (2, 1, 16, 16), dtype=jnp.float32)

    loss_weight = 0.5
    ok = True

    def check(got, want, name, rtol=1e-5, atol=1e-6):
        global ok
        got = jax.block_until_ready(got)
        same = bool(jnp.allclose(jnp.asarray(got, jnp.float32),
                                 jnp.asarray(want, jnp.float32),
                                 rtol=rtol, atol=atol))
        if not same:
            ok = False
            print(f"MISMATCH {name}")

    # Basic cases (all use the single-block, copy-free path at this size).
    cases = [
        (None, "mean"), (None, "sum"), (None, "none"),
        (weight, "mean"), (weight, "sum"), (weight, "none"),
        (weight_c1, "mean"), (weight_c1, "sum"),
    ]
    for w, red in cases:
        crit = MSELoss(loss_weight=loss_weight, reduction=red)
        check(crit(pred, target, weight=w),
              _ref_loss(pred, target, w, loss_weight, red),
              f"{red} weighted={None if w is None else tuple(w.shape)}")

    # Odd block count -> 2-shard clamp/gate path (forced tiny blocks).
    shp3 = (2, 4, 16, 24)   # 3072 elems -> 24 rows -> 3 blocks of 8 rows
    p3 = jax.random.normal(k1, shp3, dtype=jnp.float32)
    t3 = jax.random.normal(k2, shp3, dtype=jnp.float32)
    w3 = jax.random.uniform(k3, shp3, dtype=jnp.float32)
    for w in (None, w3):
        check(mse_loss(p3, t3, weight=w, loss_weight=loss_weight,
                       reduction="mean", max_block_rows=8),
              _ref_loss(p3, t3, w, loss_weight, "mean"),
              f"odd-blocks mean weighted={w is not None}")

    # Row-tail handled in the wrapper (rows not a multiple of block_rows).
    shp4 = (2, 4, 16, 40)   # 5120 elems -> 40 rows -> 2 blocks of 16 + 8-row tail
    p4 = jax.random.normal(k1, shp4, dtype=jnp.float32)
    t4 = jax.random.normal(k2, shp4, dtype=jnp.float32)
    w4 = jax.random.uniform(k3, shp4, dtype=jnp.float32)
    for w in (None, w4):
        check(mse_loss(p4, t4, weight=w, loss_weight=loss_weight,
                       reduction="mean", max_block_rows=16),
              _ref_loss(p4, t4, w, loss_weight, "mean"),
              f"row-tail mean weighted={w is not None}")

    # Ragged (non lane/sublane aligned) shape exercises the tail-pad path.
    shp5 = (2, 3, 15, 17)
    p5 = jax.random.normal(k1, shp5, dtype=jnp.float32)
    t5 = jax.random.normal(k2, shp5, dtype=jnp.float32)
    check(mse_loss(p5, t5, loss_weight=loss_weight, reduction="mean"),
          _ref_loss(p5, t5, None, loss_weight, "mean"), "ragged mean")

    # bf16 inputs (16-row sublane alignment, bf16 blocks carry f32-equal bytes).
    pb, tb = pred.astype(jnp.bfloat16), target.astype(jnp.bfloat16)
    check(mse_loss(pb, tb, loss_weight=loss_weight, reduction="mean"),
          _ref_loss(pb, tb, None, loss_weight, "mean"), "bf16 mean")

    # Multi-block elementwise ('none') path.
    check(mse_loss(p3, t3, weight=w3, loss_weight=loss_weight,
                   reduction="none", max_block_rows=8),
          _ref_loss(p3, t3, w3, loss_weight, "none"), "multi-block none")

    if ok:
        print("KERNEL_OK")
</pallas_src>

<mosaic_0001>
module attributes {stable_mosaic.version = 11 : i64} {
  func.func @_mse_sum_kernel(%arg0: i32, %arg1: i32, %arg2: memref<16x128xf32, #tpu.memory_space<vmem>>, %arg3: memref<16x128xf32, #tpu.memory_space<vmem>>, %arg4: memref<8x128xf32, #tpu.memory_space<vmem>>, %arg5: memref<8x128xf32, #tpu.memory_space<vmem>>) attributes {dimension_semantics = [#tpu.dimension_semantics<parallel>, #tpu.dimension_semantics<arbitrary>], iteration_bounds = array<i64: 1, 1>, scalar_prefetch = 0 : i64, scratch_operands = 1 : i64, tpu.core_type = #tpu.core_type<tc>, window_params = [{transform_indices = @transform_0, window_bounds = array<i64: 16, 128>}, {transform_indices = @transform_1, window_bounds = array<i64: 16, 128>}, {transform_indices = @transform_2, window_bounds = array<i64: 8, 128>}]} {
    %c0_i32 = arith.constant 0 : i32
    %0 = arith.cmpi eq, %arg1, %c0_i32 : i32
    %1 = arith.extui %0 : i1 to i32
    %c0_i32_0 = arith.constant 0 : i32
    %2 = arith.cmpi ne, %1, %c0_i32_0 : i32
    scf.if %2 {
      %cst = arith.constant 0.000000e+00 : f32
      %11 = vector.broadcast %cst : f32 to vector<8x128xf32>
      %c0 = arith.constant 0 : index
      %c0_5 = arith.constant 0 : index
      %12 = vector.load %arg5[%c0, %c0_5] : memref<8x128xf32, #tpu.memory_space<vmem>>, vector<8x128xf32>
      tpu.vector_store %arg5[%c0, %c0_5], %11 {strides = array<i32>} : memref<8x128xf32, #tpu.memory_space<vmem>>, vector<8x128xf32>,
    } else {
    }
    %c1_i32 = arith.constant 1 : i32
    %3 = arith.muli %arg0, %c1_i32 : i32
    %4 = arith.addi %3, %arg1 : i32
    %c1_i32_1 = arith.constant 1 : i32
    %5 = arith.cmpi slt, %4, %c1_i32_1 : i32
    %6 = arith.extui %5 : i1 to i32
    %c0_i32_2 = arith.constant 0 : i32
    %7 = arith.cmpi ne, %6, %c0_i32_2 : i32
    scf.if %7 {
      %c0 = arith.constant 0 : index
      %c0_5 = arith.constant 0 : index
      %11 = vector.load %arg2[%c0, %c0_5] : memref<16x128xf32, #tpu.memory_space<vmem>>, vector<16x128xf32>
      %c0_6 = arith.constant 0 : index
      %c0_7 = arith.constant 0 : index
      %12 = vector.load %arg3[%c0_6, %c0_7] : memref<16x128xf32, #tpu.memory_space<vmem>>, vector<16x128xf32>
      %13 = arith.subf %11, %12 : vector<16x128xf32>
      %c0_8 = arith.constant 0 : index
      %c0_9 = arith.constant 0 : index
      %14 = vector.load %arg5[%c0_8, %c0_9] : memref<8x128xf32, #tpu.memory_space<vmem>>, vector<8x128xf32>
      %15 = arith.mulf %13, %13 : vector<16x128xf32>
      %16 = vector.shape_cast %15 : vector<16x128xf32> to vector<2x8x128xf32>
      %cst = arith.constant dense<0.000000e+00> : vector<8x128xf32>
      %17 = vector.multi_reduction <add>, %16, %cst [0] : vector<2x8x128xf32> to vector<8x128xf32>
      %18 = arith.addf %14, %17 : vector<8x128xf32>
      %c0_10 = arith.constant 0 : index
      %c0_11 = arith.constant 0 : index
      %19 = vector.load %arg5[%c0_10, %c0_11] : memref<8x128xf32, #tpu.memory_space<vmem>>, vector<8x128xf32>
      tpu.vector_store %arg5[%c0_10, %c0_11], %18 {strides = array<i32>} : memref<8x128xf32, #tpu.memory_space<vmem>>, vector<8x128xf32>,
    } else {
    }
    %c0_i32_3 = arith.constant 0 : i32
    %8 = arith.cmpi eq, %arg1, %c0_i32_3 : i32
    %9 = arith.extui %8 : i1 to i32
    %c0_i32_4 = arith.constant 0 : i32
    %10 = arith.cmpi ne, %9, %c0_i32_4 : i32
    scf.if %10 {
      %c0 = arith.constant 0 : index
      %c0_5 = arith.constant 0 : index
      %11 = vector.load %arg5[%c0, %c0_5] : memref<8x128xf32, #tpu.memory_space<vmem>>, vector<8x128xf32>
      %cst = arith.constant 2.44140625E-4 : f32
      %12 = vector.broadcast %cst : f32 to vector<8x128xf32>
      %13 = arith.mulf %11, %12 : vector<8x128xf32>
      %c0_6 = arith.constant 0 : index
      %c0_7 = arith.constant 0 : index
      %14 = vector.load %arg4[%c0_6, %c0_7] : memref<8x128xf32, #tpu.memory_space<vmem>>, vector<8x128xf32>
      tpu.vector_store %arg4[%c0_6, %c0_7], %13 {strides = array<i32>} : memref<8x128xf32, #tpu.memory_space<vmem>>, vector<8x128xf32>,
    } else {
    }
    return
  }
  func.func @transform_0(%arg0: i32, %arg1: i32) -> (i32, i32) {
    %c1_i32 = arith.constant 1 : i32
    %0 = arith.muli %arg0, %c1_i32 : i32
    %1 = arith.addi %0, %arg1 : i32
    %c0_i32 = arith.constant 0 : i32
    %c0_i32_0 = arith.constant 0 : i32
    return %1, %c0_i32 : i32, i32
  }
  func.func @transform_1(%arg0: i32, %arg1: i32) -> (i32, i32) {
    %c1_i32 = arith.constant 1 : i32
    %0 = arith.muli %arg0, %c1_i32 : i32
    %1 = arith.addi %0, %arg1 : i32
    %c0_i32 = arith.constant 0 : i32
    %c0_i32_0 = arith.constant 0 : i32
    return %1, %c0_i32 : i32, i32
  }
  func.func @transform_2(%arg0: i32, %arg1: i32) -> (i32, i32) {
    %c0_i32 = arith.constant 0 : i32
    %c0_i32_0 = arith.constant 0 : i32
    return %arg0, %c0_i32 : i32, i32
  }
}

</mosaic_0001>

<bundles_post_ra>
// kernel: tpu_custom_call.1
= control target key start
LH: loop header
LB: loop body
LE: loop exit
PB: predicated region body
PF: predicated region fallthrough
CT: control target
= control target key end

     0   :  { %7 = vsyncpa [#allocation4], 0  ;;  %s196_s0 = inlined_call_operand.hbm [shape: f32[16,128], index: 0, kind: input, shape index: {}]   ;;  %s197_s1 = inlined_call_operand.hbm [shape: f32[16,128], index: 1, kind: input, shape index: {}]   ;;  %s198_s2 = inlined_call_operand.hbm [shape: f32[8,128], index: 2, kind: output, shape index: {}]  }
   0x1   :  { %8 = vsyncpa [#allocation7], 0 }
   0x2   :  { %9 = vsyncpa [#allocation5], 0  ;;  %s167_s9 = smov [#allocation3]  }
   0x3   :  { %s19_s10 = sshll.u32 %s167_s9, 4  ;;  %s20_s10 = int_to_ptr.vmem [resolvable:$true] %s19_s10 }
   0x4   :  { %s109_s11 = scalar_lea.vmem %s20_s10, 256  ;;  %p114_p1 = scmp.lt.s32.totalorder %s20_s10, %s20_s10 }
   0x5   :  { %p110_p0 = scmp.ne.s32.totalorder %s20_s10, %s109_s11  ;;  %p115_p2 = scmp.lt.s32.totalorder %s109_s11, %s109_s11 }
   0x7   :  { %p116_p3 = por %p115_p2, %p114_p1 }
   0x9   :  { %p117_p4 = pnand %p116_p3, %p110_p0 }
   0xb   :  { %120 = shalt.err (!%p117_p4)
}
   0xc   :  { %s168_s12 = smov 128   ;;  %s169_s13 = smov 8  }
   0xd   :  { %25 = dma.hbm_to_vmem [thread:$0]  %s196_s0, 256, %s20_s10, [#allocation4], %s168_s12, %s168_s12, %s169_s13  }
   0xe   :  { %s170_s16 = smov [#allocation6]  }
   0xf   :  { %s35_s17 = sshll.u32 %s170_s16, 4  ;;  %s36_s17 = int_to_ptr.vmem [resolvable:$true] %s35_s17 }
  0x10   :  { %s129_s18 = scalar_lea.vmem %s36_s17, 256  ;;  %p134_p6 = scmp.lt.s32.totalorder %s36_s17, %s36_s17 }
  0x11   :  { %p130_p5 = scmp.ne.s32.totalorder %s36_s17, %s129_s18  ;;  %p135_p7 = scmp.lt.s32.totalorder %s129_s18, %s129_s18 }
  0x13   :  { %p136_p8 = por %p135_p7, %p134_p6 }
  0x15   :  { %p137_p9 = pnand %p136_p8, %p130_p5 }
  0x17   :  { %140 = shalt.err (!%p137_p9)
}
  0x18   :  { %41 = dma.hbm_to_vmem [thread:$0]  %s197_s1, 256, %s36_s17, [#allocation7], %s168_s12, %s168_s12, %s169_s13  }
  0x19   :  { %161 = dma.done.wait [#allocation4], 256  }
  0x1a   :  { %162 = vsyncadd [#allocation4], 4294967040 }
  0x1b   :  { %163 = dma.done.wait [#allocation7], 256  }
  0x1c   :  { %164 = vsyncadd [#allocation7], 4294967040  ;;  %v62_v0 = vld [vmem:[#allocation3] sm:$0xff]  ;;  %v63_v1 = vld [vmem:[#allocation3 + $0x8] sm:$0xff]  ;;  %s171_s0 = smov [#allocation8]  }
  0x1d   :  { %v64_v2 = vld [vmem:[#allocation6] sm:$0xff]  ;;  %v65_v3 = vld [vmem:[#allocation6 + $0x8] sm:$0xff]  ;;  %s86_s21 = sshll.u32 %s171_s0, 4  ;;  %s87_s21 = int_to_ptr.vmem [resolvable:$true] %s86_s21 }
  0x1e   :  { %v66_v4 = vsub.f32 %v62_v0, %v64_v2  ;;  %v67_v5 = vsub.f32 %v63_v1, %v65_v3  ;;  %s141_s22 = scalar_lea.vmem %s87_s21, 128  ;;  %p146_p11 = scmp.lt.s32.totalorder %s87_s21, %s87_s21 }
  0x1f   :  { %p142_p10 = scmp.ne.s32.totalorder %s87_s21, %s141_s22  ;;  %p147_p12 = scmp.lt.s32.totalorder %s141_s22, %s141_s22 }
  0x20   :  { %v69_v6 = vmul.f32 %v66_v4, %v66_v4  ;;  %v70_v7 = vmul.f32 %v67_v5, %v67_v5 }
  0x21   :  { %p148_p13 = por %p147_p12, %p146_p11 }
  0x22   :  { %v71_v8 = vadd.f32 %v70_v7, %v69_v6 }
  0x23   :  { %p149_p0 = pnand %p148_p13, %p142_p10 }
  0x24   :  { %v78_v9 = vmul.f32 0.00024414063, %v71_v8 }
  0x26   :  { %79 = vst [vmem:[#allocation8] sm:$0xff] %v78_v9 }
  0x27   :  { %152 = shalt.err (!%p149_p0)
}
  0x28   :  { %89 = dma.vmem_to_hbm [thread:$0]  %s87_s21, 128, %s198_s2, [#allocation5]  }
  0x29   :  { %165 = dma.done.wait [#allocation5], 128  }
  0x2a   :  { %166 = vsyncadd [#allocation5], 4294967168 }
  0x2b   :  { %93 = vsyncpa [#allocation4], 1 }
  0x2c   :  { %94 = vsyncpa [#allocation7], 1 }
  0x2d   :  { %95 = vsyncpa [#allocation5], 1 }

</bundles_post_ra>
